<compile_context>
chip_gen: v5e
topology: v5e:2x2
jax: 0.10.0
libtpu: 0.0.40
codegen_flags: <defaults>
</compile_context>

<pallas_src>
import functools

import jax
import jax.numpy as jnp
from jax.experimental import pallas as pl
from jax.experimental.pallas import tpu as pltpu


def _round_up(x, m):
    return (x + m - 1) // m * m


def _ffn_kernel(x_ref, w1_ref, b1_ref, w2_ref, b2_ref, g_ref, beta_ref,
                o_ref, acc_ref, *, eps, inv_d):
    j = pl.program_id(1)

    @pl.when(j == 0)
    def _init():
        acc_ref[...] = jnp.zeros_like(acc_ref)

    # fc1 slice (this d_ff tile) + bias + ReLU.  Native dtype into the MXU,
    # f32 accumulation via preferred_element_type.
    h = jnp.dot(x_ref[...], w1_ref[...], preferred_element_type=jnp.float32)
    h = jnp.maximum(h + b1_ref[...].astype(jnp.float32), 0.0)

    # fc2 partial product over this d_ff slice, accumulated in f32 scratch.
    acc_ref[...] += jnp.dot(h.astype(w2_ref.dtype), w2_ref[...],
                            preferred_element_type=jnp.float32)

    @pl.when(j == pl.num_programs(1) - 1)
    def _epilogue():
        x = x_ref[...].astype(jnp.float32)
        y = acc_ref[...] + b2_ref[...].astype(jnp.float32)
        z = x + y
        # LayerNorm over the true d_model.  Padded lanes are zero, so plain
        # sums divided by the true width give the correct moments.
        s = jnp.sum(z, axis=-1, keepdims=True)
        s2 = jnp.sum(z * z, axis=-1, keepdims=True)
        mean = s * inv_d
        var = jnp.maximum(s2 * inv_d - mean * mean, 0.0)
        normed = (z - mean) * jax.lax.rsqrt(var + eps)
        out = normed * g_ref[...].astype(jnp.float32) + beta_ref[...].astype(jnp.float32)
        o_ref[...] = out.astype(o_ref.dtype)


def feed_forward_pallas(x, w1, b1, w2, b2, gamma, beta, *, eps=1e-5,
                        tm=256, tf=512):
    """x: (..., d_model). Weights follow the math convention:
       w1: (d_model, d_ff), w2: (d_ff, d_model) (PyTorch weight transposed)."""
    orig_shape = x.shape
    d_model = x.shape[-1]
    d_ff = w1.shape[1]
    x2 = x.reshape(-1, d_model)
    n = x2.shape[0]
    dt = x.dtype

    # Lane-dense padding: d_model and the d_ff tile become multiples of 128.
    dm_p = _round_up(d_model, 128)
    tf = min(tf, _round_up(d_ff, 128))
    df_p = _round_up(d_ff, tf)

    # Row tile: clamp to the sublane-rounded row count, then pad rows to it.
    tm = min(tm, _round_up(n, 8))
    n_p = _round_up(n, tm)

    # Zero padding keeps fc1/fc2 exact and the LN moments exact (see kernel).
    x_p = jnp.zeros((n_p, dm_p), dt).at[:n, :d_model].set(x2)
    w1_p = jnp.zeros((dm_p, df_p), w1.dtype).at[:d_model, :d_ff].set(w1)
    b1_p = jnp.zeros((1, df_p), jnp.float32).at[0, :d_ff].set(b1.astype(jnp.float32))
    w2_p = jnp.zeros((df_p, dm_p), w2.dtype).at[:d_ff, :d_model].set(w2)
    b2_p = jnp.zeros((1, dm_p), jnp.float32).at[0, :d_model].set(b2.astype(jnp.float32))
    g_p = jnp.zeros((1, dm_p), jnp.float32).at[0, :d_model].set(gamma.astype(jnp.float32))
    be_p = jnp.zeros((1, dm_p), jnp.float32).at[0, :d_model].set(beta.astype(jnp.float32))

    grid = (n_p // tm, df_p // tf)

    # VMEM budget (double-buffered tiles + f32 accumulator); set the limit
    # explicitly so tiling keeps working on v7x's smaller VMEM.
    isz = jnp.dtype(dt).itemsize
    w_isz = jnp.dtype(w1.dtype).itemsize
    vmem_bytes = (2 * tm * dm_p * isz            # x row tile
                  + 2 * dm_p * tf * w_isz        # w1 slice
                  + 2 * tf * dm_p * w_isz        # w2 slice
                  + 2 * tm * dm_p * isz          # out tile
                  + tm * dm_p * 4                # accumulator
                  + 2 * (tf + 3 * dm_p) * 4)     # biases / LN params
    vmem_limit = int(min(max(vmem_bytes + (4 << 20), 32 << 20), 100 << 20))

    out = pl.pallas_call(
        functools.partial(_ffn_kernel, eps=eps, inv_d=1.0 / d_model),
        out_shape=jax.ShapeDtypeStruct((n_p, dm_p), dt),
        grid_spec=pltpu.PrefetchScalarGridSpec(
            num_scalar_prefetch=0,
            grid=grid,
            in_specs=[
                pl.BlockSpec((tm, dm_p), lambda i, j: (i, 0)),   # x rows (resident over j)
                pl.BlockSpec((dm_p, tf), lambda i, j: (0, j)),   # w1 d_ff slice
                pl.BlockSpec((1, tf), lambda i, j: (0, j)),      # b1 slice
                pl.BlockSpec((tf, dm_p), lambda i, j: (j, 0)),   # w2 d_ff slice
                pl.BlockSpec((1, dm_p), lambda i, j: (0, 0)),    # b2
                pl.BlockSpec((1, dm_p), lambda i, j: (0, 0)),    # ln gamma
                pl.BlockSpec((1, dm_p), lambda i, j: (0, 0)),    # ln beta
            ],
            out_specs=pl.BlockSpec((tm, dm_p), lambda i, j: (i, 0)),
            scratch_shapes=[pltpu.VMEM((tm, dm_p), jnp.float32)],
        ),
        compiler_params=pltpu.CompilerParams(
            dimension_semantics=("parallel", "arbitrary"),
            vmem_limit_bytes=vmem_limit),
    )(x_p, w1_p, b1_p, w2_p, b2_p, g_p, be_p)

    return out[:n, :d_model].reshape(orig_shape)


def feed_forward_ref(x, w1, b1, w2, b2, gamma, beta, eps=1e-5):
    h = jnp.maximum(x @ w1 + b1, 0.0)
    y = h @ w2 + b2
    z = x + y
    mean = jnp.mean(z, axis=-1, keepdims=True)
    var = jnp.mean((z - mean) ** 2, axis=-1, keepdims=True)
    return (z - mean) * jax.lax.rsqrt(var + eps) * gamma + beta


if __name__ == "__main__":
    # Small shapes consistent with the module (d_model / d_ff scaled down).
    batch, seq, d_model, d_ff = 2, 8, 32, 256

    key = jax.random.PRNGKey(0)
    kx, kw1, kb1, kw2, kb2 = jax.random.split(key, 5)

    x = jax.random.normal(kx, (batch, seq, d_model), dtype=jnp.float32)

    # Deterministic synthetic parameters (Linear / LayerNorm shapes).
    w1 = jax.random.normal(kw1, (d_model, d_ff), dtype=jnp.float32) * 0.05
    b1 = jax.random.normal(kb1, (d_ff,), dtype=jnp.float32) * 0.01
    w2 = jax.random.normal(kw2, (d_ff, d_model), dtype=jnp.float32) * 0.05
    b2 = jax.random.normal(kb2, (d_model,), dtype=jnp.float32) * 0.01
    gamma = jnp.ones((d_model,), dtype=jnp.float32)
    beta = jnp.zeros((d_model,), dtype=jnp.float32)

    ref = feed_forward_ref(x, w1, b1, w2, b2, gamma, beta)

    # 1) Default (large) tiles -- single-step grid at this toy size.
    out = feed_forward_pallas(x, w1, b1, w2, b2, gamma, beta)
    out = jax.block_until_ready(out)
    assert out.shape == (batch, seq, d_model)
    assert jnp.allclose(out, ref, atol=2e-4, rtol=1e-4), "mismatch vs reference (default tiles)"

    # 2) Small tiles to exercise the multi-step grid: row axis AND the d_ff
    #    accumulation axis with the pl.when-gated LayerNorm epilogue.
    out2 = feed_forward_pallas(x, w1, b1, w2, b2, gamma, beta, tm=8, tf=128)
    out2 = jax.block_until_ready(out2)
    assert jnp.allclose(out2, ref, atol=2e-4, rtol=1e-4), "mismatch vs reference (tiled grid)"

    print("KERNEL_OK")
</pallas_src>

<mosaic_0001>
module attributes {stable_mosaic.version = 11 : i64} {
  func.func @_ffn_kernel(%arg0: i32, %arg1: i32, %arg2: memref<16x128xf32, #tpu.memory_space<vmem>>, %arg3: memref<128x256xf32, #tpu.memory_space<vmem>>, %arg4: memref<1x256xf32, #tpu.memory_space<vmem>>, %arg5: memref<256x128xf32, #tpu.memory_space<vmem>>, %arg6: memref<1x128xf32, #tpu.memory_space<vmem>>, %arg7: memref<1x128xf32, #tpu.memory_space<vmem>>, %arg8: memref<1x128xf32, #tpu.memory_space<vmem>>, %arg9: memref<16x128xf32, #tpu.memory_space<vmem>>, %arg10: memref<16x128xf32, #tpu.memory_space<vmem>>) attributes {dimension_semantics = [#tpu.dimension_semantics<parallel>, #tpu.dimension_semantics<arbitrary>], iteration_bounds = array<i64: 1, 1>, scalar_prefetch = 0 : i64, scratch_operands = 1 : i64, tpu.core_type = #tpu.core_type<tc>, window_params = [{transform_indices = @transform_0, window_bounds = array<i64: 16, 128>}, {transform_indices = @transform_1, window_bounds = array<i64: 128, 256>}, {transform_indices = @transform_2, window_bounds = array<i64: 1, 256>}, {transform_indices = @transform_3, window_bounds = array<i64: 256, 128>}, {pipeline_mode = #tpu.pipeline_mode<synchronous>, transform_indices = @transform_4, window_bounds = array<i64: 1, 128>}, {pipeline_mode = #tpu.pipeline_mode<synchronous>, transform_indices = @transform_5, window_bounds = array<i64: 1, 128>}, {pipeline_mode = #tpu.pipeline_mode<synchronous>, transform_indices = @transform_6, window_bounds = array<i64: 1, 128>}, {transform_indices = @transform_7, window_bounds = array<i64: 16, 128>}]} {
    %c0_i32 = arith.constant 0 : i32
    %0 = arith.cmpi eq, %arg1, %c0_i32 : i32
    %1 = arith.extui %0 : i1 to i32
    %c0_i32_0 = arith.constant 0 : i32
    %2 = arith.cmpi ne, %1, %c0_i32_0 : i32
    scf.if %2 {
      %cst_16 = arith.constant 0.000000e+00 : f32
      %19 = vector.broadcast %cst_16 : f32 to vector<16x128xf32>
      %c0_17 = arith.constant 0 : index
      %c0_18 = arith.constant 0 : index
      %20 = vector.load %arg10[%c0_17, %c0_18] : memref<16x128xf32, #tpu.memory_space<vmem>>, vector<16x128xf32>
      tpu.vector_store %arg10[%c0_17, %c0_18], %19 {strides = array<i32>} : memref<16x128xf32, #tpu.memory_space<vmem>>, vector<16x128xf32>,
    } else {
    }
    %c0 = arith.constant 0 : index
    %c0_1 = arith.constant 0 : index
    %3 = vector.load %arg2[%c0, %c0_1] : memref<16x128xf32, #tpu.memory_space<vmem>>, vector<16x128xf32>
    %c0_2 = arith.constant 0 : index
    %c0_3 = arith.constant 0 : index
    %4 = vector.load %arg3[%c0_2, %c0_3] : memref<128x256xf32, #tpu.memory_space<vmem>>, vector<128x256xf32>
    %cst = arith.constant dense<0.000000e+00> : vector<16x256xf32>
    %5 = tpu.matmul %3, %4, %cst {dimension_numbers = #tpu.dot_dimension_numbers<[1], [0], [0], [1], [0, 0, 1, 1], [], []>} : vector<16x128xf32>, vector<128x256xf32>, vector<16x256xf32> -> vector<16x256xf32>
    %c0_4 = arith.constant 0 : index
    %c0_5 = arith.constant 0 : index
    %6 = vector.load %arg4[%c0_4, %c0_5] : memref<1x256xf32, #tpu.memory_space<vmem>>, vector<1x256xf32>
    %7 = vector.broadcast %6 : vector<1x256xf32> to vector<16x256xf32>
    %8 = arith.addf %5, %7 : vector<16x256xf32>
    %cst_6 = arith.constant 0.000000e+00 : f32
    %9 = vector.broadcast %cst_6 : f32 to vector<16x256xf32>
    %10 = arith.maximumf %8, %9 : vector<16x256xf32>
    %c0_7 = arith.constant 0 : index
    %c0_8 = arith.constant 0 : index
    %11 = vector.load %arg10[%c0_7, %c0_8] : memref<16x128xf32, #tpu.memory_space<vmem>>, vector<16x128xf32>
    %c0_9 = arith.constant 0 : index
    %c0_10 = arith.constant 0 : index
    %12 = vector.load %arg5[%c0_9, %c0_10] : memref<256x128xf32, #tpu.memory_space<vmem>>, vector<256x128xf32>
    %cst_11 = arith.constant dense<0.000000e+00> : vector<16x128xf32>
    %13 = tpu.matmul %10, %12, %cst_11 {dimension_numbers = #tpu.dot_dimension_numbers<[1], [0], [0], [1], [0, 0, 1, 1], [], []>} : vector<16x256xf32>, vector<256x128xf32>, vector<16x128xf32> -> vector<16x128xf32>
    %14 = arith.addf %11, %13 : vector<16x128xf32>
    %c0_12 = arith.constant 0 : index
    %c0_13 = arith.constant 0 : index
    %15 = vector.load %arg10[%c0_12, %c0_13] : memref<16x128xf32, #tpu.memory_space<vmem>>, vector<16x128xf32>
    tpu.vector_store %arg10[%c0_12, %c0_13], %14 {strides = array<i32>} : memref<16x128xf32, #tpu.memory_space<vmem>>, vector<16x128xf32>,
    %c0_i32_14 = arith.constant 0 : i32
    %16 = arith.cmpi eq, %arg1, %c0_i32_14 : i32
    %17 = arith.extui %16 : i1 to i32
    %c0_i32_15 = arith.constant 0 : i32
    %18 = arith.cmpi ne, %17, %c0_i32_15 : i32
    scf.if %18 {
      %c0_16 = arith.constant 0 : index
      %c0_17 = arith.constant 0 : index
      %19 = vector.load %arg2[%c0_16, %c0_17] : memref<16x128xf32, #tpu.memory_space<vmem>>, vector<16x128xf32>
      %c0_18 = arith.constant 0 : index
      %c0_19 = arith.constant 0 : index
      %20 = vector.load %arg10[%c0_18, %c0_19] : memref<16x128xf32, #tpu.memory_space<vmem>>, vector<16x128xf32>
      %c0_20 = arith.constant 0 : index
      %c0_21 = arith.constant 0 : index
      %21 = vector.load %arg6[%c0_20, %c0_21] : memref<1x128xf32, #tpu.memory_space<vmem>>, vector<1x128xf32>
      %22 = vector.broadcast %21 : vector<1x128xf32> to vector<16x128xf32>
      %23 = arith.addf %20, %22 : vector<16x128xf32>
      %24 = arith.addf %19, %23 : vector<16x128xf32>
      %cst_22 = arith.constant dense<0.000000e+00> : vector<16xf32>
      %25 = vector.multi_reduction <add>, %24, %cst_22 [1] : vector<16x128xf32> to vector<16xf32>
      %26 = vector.shape_cast %25 : vector<16xf32> to vector<16x1xf32>
      %27 = arith.mulf %24, %24 : vector<16x128xf32>
      %cst_23 = arith.constant dense<0.000000e+00> : vector<16xf32>
      %28 = vector.multi_reduction <add>, %27, %cst_23 [1] : vector<16x128xf32> to vector<16xf32>
      %29 = vector.shape_cast %28 : vector<16xf32> to vector<16x1xf32>
      %cst_24 = arith.constant 3.125000e-02 : f32
      %30 = vector.broadcast %cst_24 : f32 to vector<16x1xf32>
      %31 = arith.mulf %26, %30 : vector<16x1xf32>
      %cst_25 = arith.constant 3.125000e-02 : f32
      %32 = vector.broadcast %cst_25 : f32 to vector<16x1xf32>
      %33 = arith.mulf %29, %32 : vector<16x1xf32>
      %34 = arith.mulf %31, %31 : vector<16x1xf32>
      %35 = arith.subf %33, %34 : vector<16x1xf32>
      %cst_26 = arith.constant 0.000000e+00 : f32
      %36 = vector.broadcast %cst_26 : f32 to vector<16x1xf32>
      %37 = arith.maximumf %35, %36 : vector<16x1xf32>
      %38 = vector.broadcast %31 : vector<16x1xf32> to vector<16x128xf32>
      %39 = arith.subf %24, %38 : vector<16x128xf32>
      %cst_27 = arith.constant 9.99999974E-6 : f32
      %40 = vector.broadcast %cst_27 : f32 to vector<16x1xf32>
      %41 = arith.addf %37, %40 : vector<16x1xf32>
      %42 = math.rsqrt %41 : vector<16x1xf32>
      %43 = vector.broadcast %42 : vector<16x1xf32> to vector<16x128xf32>
      %44 = arith.mulf %39, %43 : vector<16x128xf32>
      %c0_28 = arith.constant 0 : index
      %c0_29 = arith.constant 0 : index
      %45 = vector.load %arg7[%c0_28, %c0_29] : memref<1x128xf32, #tpu.memory_space<vmem>>, vector<1x128xf32>
      %46 = vector.broadcast %45 : vector<1x128xf32> to vector<16x128xf32>
      %47 = arith.mulf %44, %46 : vector<16x128xf32>
      %c0_30 = arith.constant 0 : index
      %c0_31 = arith.constant 0 : index
      %48 = vector.load %arg8[%c0_30, %c0_31] : memref<1x128xf32, #tpu.memory_space<vmem>>, vector<1x128xf32>
      %49 = vector.broadcast %48 : vector<1x128xf32> to vector<16x128xf32>
      %50 = arith.addf %47, %49 : vector<16x128xf32>
      %c0_32 = arith.constant 0 : index
      %c0_33 = arith.constant 0 : index
      %51 = vector.load %arg9[%c0_32, %c0_33] : memref<16x128xf32, #tpu.memory_space<vmem>>, vector<16x128xf32>
      tpu.vector_store %arg9[%c0_32, %c0_33], %50 {strides = array<i32>} : memref<16x128xf32, #tpu.memory_space<vmem>>, vector<16x128xf32>,
    } else {
    }
    return
  }
  func.func @transform_0(%arg0: i32, %arg1: i32) -> (i32, i32) {
    %c0_i32 = arith.constant 0 : i32
    %c0_i32_0 = arith.constant 0 : i32
    return %arg0, %c0_i32 : i32, i32
  }
  func.func @transform_1(%arg0: i32, %arg1: i32) -> (i32, i32) {
    %c0_i32 = arith.constant 0 : i32
    %c0_i32_0 = arith.constant 0 : i32
    return %c0_i32, %arg1 : i32, i32
  }
  func.func @transform_2(%arg0: i32, %arg1: i32) -> (i32, i32) {
    %c0_i32 = arith.constant 0 : i32
    %c0_i32_0 = arith.constant 0 : i32
    return %c0_i32, %arg1 : i32, i32
  }
  func.func @transform_3(%arg0: i32, %arg1: i32) -> (i32, i32) {
    %c0_i32 = arith.constant 0 : i32
    %c0_i32_0 = arith.constant 0 : i32
    return %arg1, %c0_i32 : i32, i32
  }
  func.func @transform_4(%arg0: i32, %arg1: i32) -> (i32, i32) {
    %c0_i32 = arith.constant 0 : i32
    %c0_i32_0 = arith.constant 0 : i32
    %c0_i32_1 = arith.constant 0 : i32
    return %c0_i32, %c0_i32_0 : i32, i32
  }
  func.func @transform_5(%arg0: i32, %arg1: i32) -> (i32, i32) {
    %c0_i32 = arith.constant 0 : i32
    %c0_i32_0 = arith.constant 0 : i32
    %c0_i32_1 = arith.constant 0 : i32
    return %c0_i32, %c0_i32_0 : i32, i32
  }
  func.func @transform_6(%arg0: i32, %arg1: i32) -> (i32, i32) {
    %c0_i32 = arith.constant 0 : i32
    %c0_i32_0 = arith.constant 0 : i32
    %c0_i32_1 = arith.constant 0 : i32
    return %c0_i32, %c0_i32_0 : i32, i32
  }
  func.func @transform_7(%arg0: i32, %arg1: i32) -> (i32, i32) {
    %c0_i32 = arith.constant 0 : i32
    %c0_i32_0 = arith.constant 0 : i32
    return %arg0, %c0_i32 : i32, i32
  }
}

</mosaic_0001>

<bundles_post_ra>
// kernel: tpu_custom_call.1
= control target key start
LH: loop header
LB: loop body
LE: loop exit
PB: predicated region body
PF: predicated region fallthrough
CT: control target
= control target key end

     0   :  { %12 = vsyncpa [#allocation4], 0  ;;  %s590_s0 = inlined_call_operand.hbm [shape: f32[16,128], index: 0, kind: input, shape index: {}]   ;;  %s591_s1 = inlined_call_operand.hbm [shape: f32[128,256], index: 1, kind: input, shape index: {}]   ;;  %s592_s2 = inlined_call_operand.hbm [shape: f32[1,256], index: 2, kind: input, shape index: {}]   ;;  %s593_s3 = inlined_call_operand.hbm [shape: f32[256,128], index: 3, kind: input, shape index: {}]   ;;  %s594_s4 = inlined_call_operand.vmem [shape: f32[1,128], index: 4, kind: input, shape index: {}]   ;;  %s595_s5 = inlined_call_operand.vmem [shape: f32[1,128], index: 5, kind: input, shape index: {}]   ;;  %s596_s6 = inlined_call_operand.vmem [shape: f32[1,128], index: 6, kind: input, shape index: {}]   ;;  %s597_s7 = inlined_call_operand.hbm [shape: f32[16,128], index: 7, kind: output, shape index: {}]  }
   0x1   :  { %13 = vsyncpa [#allocation7], 0 }
   0x2   :  { %14 = vsyncpa [#allocation10], 0  ;;  %s33_s26 = sshll.u32 %s591_s1, 4  ;;  %s34_s26 = int_to_ptr.hbm [resolvable:$true] %s33_s26 }
   0x3   :  { %15 = vsyncpa [#allocation5], 0  ;;  %s508_s27 = smov [#allocation6]   ;;  %s20_s8 = sshll.u32 %s590_s0, 4  ;;  %s21_s8 = int_to_ptr.hbm [resolvable:$true] %s20_s8 }
   0x4   :  { %s35_s28 = sshll.u32 %s508_s27, 4  ;;  %s509_s9 = smov 256   ;;  %s36_s28 = int_to_ptr.vmem [resolvable:$true] %s35_s28 }
   0x5   :  { %s510_s10 = smov 16   ;;  %s511_s11 = smov [#allocation3]  }
   0x6   :  { %41 = dma.hbm_to_vmem [thread:$0]  %s34_s26, 4096, %s36_s28, [#allocation7], %s509_s9, %s509_s9, %s510_s10  }
   0x7   :  { %s22_s12 = sshll.u32 %s511_s11, 4  ;;  %s512_s13 = smov 128   ;;  %s23_s12 = int_to_ptr.vmem [resolvable:$true] %s22_s12 }
   0x8   :  { %s513_s14 = smov 8   ;;  %s47_s16 = sshll.u32 %s592_s2, 4  ;;  %s48_s16 = int_to_ptr.hbm [resolvable:$true] %s47_s16 }
   0x9   :  { %28 = dma.hbm_to_vmem [thread:$0]  %s21_s8, 256, %s23_s12, [#allocation4], %s512_s13, %s512_s13, %s513_s14  }
   0xa   :  { %s514_s17 = smov [#allocation8]   ;;  %s57_s20 = sshll.u32 %s593_s3, 4  ;;  %s58_s20 = int_to_ptr.hbm [resolvable:$true] %s57_s20 }
   0xb   :  { %s49_s0 = sshll.u32 %s514_s17, 4  ;;  %s515_s21 = smov [#allocation9]   ;;  %s50_s0 = int_to_ptr.vmem [resolvable:$true] %s49_s0 }
   0xc   :  { %52 = dma.hbm_to_vmem [thread:$0]  %s48_s16, 32, %s50_s0, [#allocation7]  }
   0xd   :  { %s59_s22 = sshll.u32 %s515_s21, 4  ;;  %s60_s22 = int_to_ptr.vmem [resolvable:$true] %s59_s22 }
   0xe   :  { %65 = dma.hbm_to_vmem [thread:$0]  %s58_s20, 4096, %s60_s22, [#allocation10], %s512_s13, %s512_s13, %s513_s14  }
   0xf   :  { %500 = dma.done.wait [#allocation4], 256  }
  0x10   :  { %501 = vsyncadd [#allocation4], 4294967040 }
  0x11   :  { %502 = dma.done.wait [#allocation7], 4128  }
  0x12   :  { %503 = vsyncadd [#allocation7], 4294963168 }
  0x13   :  { %504 = dma.done.wait [#allocation10], 4096  }
  0x14   :  { %505 = vsyncadd [#allocation10], 4294963200  ;;  %v126_v0 = vld [vmem:[#allocation6 + $0xf0] sm:$0xff]  ;;  %v127_v1 = vld [vmem:[#allocation6 + $0xf8] sm:$0xff]  ;;  %s349_s29 = sshll.u32 %s597_s7, 4  ;;  %s350_s29 = int_to_ptr.hbm [resolvable:$true] %s349_s29 }
  0x15   :  { %v124_v2 = vld [vmem:[#allocation6 + $0xe0] sm:$0xff]  ;;  %134 = vmatpush.msra.mxu0 %v126_v0  ;;  %157 = vmatpush.msra.mxu1 %v127_v1  ;;  %v125_v3 = vld [vmem:[#allocation6 + $0xe8] sm:$0xff]  ;;  %v122_v4 = vld [vmem:[#allocation6 + $0xd0] sm:$0xff] }
  0x16   :  { %v123_v5 = vld [vmem:[#allocation6 + $0xd8] sm:$0xff]  ;;  %v120_v6 = vld [vmem:[#allocation6 + $0xc0] sm:$0xff]  ;;  %v121_v7 = vld [vmem:[#allocation6 + $0xc8] sm:$0xff] }
  0x17   :  { %135 = vmatpush.msra.mxu0 %v124_v2  ;;  %158 = vmatpush.msra.mxu1 %v125_v3  ;;  %v118_v8 = vld [vmem:[#allocation6 + $0xb0] sm:$0xff]  ;;  %v119_v9 = vld [vmem:[#allocation6 + $0xb8] sm:$0xff]  ;;  %v116_v10 = vld [vmem:[#allocation6 + $0xa0] sm:$0xff] }
  0x18   :  { %v117_v11 = vld [vmem:[#allocation6 + $0xa8] sm:$0xff]  ;;  %v114_v12 = vld [vmem:[#allocation6 + $0x90] sm:$0xff]  ;;  %v115_v13 = vld [vmem:[#allocation6 + $0x98] sm:$0xff] }
  0x19   :  { %136 = vmatpush.msra.mxu0 %v122_v4  ;;  %159 = vmatpush.msra.mxu1 %v123_v5  ;;  %v112_v14 = vld [vmem:[#allocation6 + $0x80] sm:$0xff]  ;;  %v113_v17 = vld [vmem:[#allocation6 + $0x88] sm:$0xff]  ;;  %v200_v18 = vld [vmem:[#allocation9 + $0x70] sm:$0xff] }
  0x1a   :  { %v201_v15 = vld [vmem:[#allocation9 + $0x78] sm:$0xff]  ;;  %v216_v19 = vld [vmem:[#allocation9 + $0xf0] sm:$0xff]  ;;  %v199_v20 = vld [vmem:[#allocation9 + $0x68] sm:$0xff] }
  0x1b   :  { %137 = vmatpush.msra.mxu0 %v120_v6  ;;  %160 = vmatpush.msra.mxu1 %v121_v7  ;;  %v217_v16 = vld [vmem:[#allocation9 + $0xf8] sm:$0xff]  ;;  %v215_v21 = vld [vmem:[#allocation9 + $0xe8] sm:$0xff]  ;;  %v198_v24 = vld [vmem:[#allocation9 + $0x60] sm:$0xff] }
  0x1c   :  { %218 = vmatpush.msra.mxu2 %v201_v15  ;;  %241 = vmatpush.msra.mxu3 %v217_v16  ;;  %v110_v22 = vld [vmem:[#allocation6 + $0x70] sm:$0xff]  ;;  %v111_v23 = vld [vmem:[#allocation6 + $0x78] sm:$0xff]  ;;  %v214_v25 = vld [vmem:[#allocation9 + $0xe0] sm:$0xff] }
  0x1d   :  { %138 = vmatpush.msra.mxu0 %v118_v8  ;;  %161 = vmatpush.msra.mxu1 %v119_v9  ;;  %v108_v26 = vld [vmem:[#allocation6 + $0x60] sm:$0xff]  ;;  %v109_v27 = vld [vmem:[#allocation6 + $0x68] sm:$0xff]  ;;  %v106_v30 = vld [vmem:[#allocation6 + $0x50] sm:$0xff] }
  0x1e   :  { %219 = vmatpush.msra.mxu2 %v200_v18  ;;  %242 = vmatpush.msra.mxu3 %v216_v19  ;;  %v197_v28 = vld [vmem:[#allocation9 + $0x58] sm:$0xff]  ;;  %v196_v33 = vld [vmem:[#allocation9 + $0x50] sm:$0xff]  ;;  %v105_v35 = vld [vmem:[#allocation6 + $0x48] sm:$0xff] }
  0x1f   :  { %139 = vmatpush.msra.mxu0 %v116_v10  ;;  %162 = vmatpush.msra.mxu1 %v117_v11  ;;  %v213_v29 = vld [vmem:[#allocation9 + $0xd8] sm:$0xff]  ;;  %v212_v34 = vld [vmem:[#allocation9 + $0xd0] sm:$0xff]  ;;  %v195_v36 = vld [vmem:[#allocation9 + $0x48] sm:$0xff] }
  0x20   :  { %220 = vmatpush.msra.mxu2 %v199_v20  ;;  %243 = vmatpush.msra.mxu3 %v215_v21  ;;  %v107_v31 = vld [vmem:[#allocation6 + $0x58] sm:$0xff]  ;;  %v104_v32 = vld [vmem:[#allocation6 + $0x40] sm:$0xff]  ;;  %v211_v37 = vld [vmem:[#allocation9 + $0xc8] sm:$0xff] }
  0x21   :  { %140 = vmatpush.msra.mxu0 %v114_v12  ;;  %163 = vmatpush.msra.mxu1 %v115_v13  ;;  %v102_v38 = vld [vmem:[#allocation6 + $0x30] sm:$0xff]  ;;  %v103_v39 = vld [vmem:[#allocation6 + $0x38] sm:$0xff]  ;;  %v194_v40 = vld [vmem:[#allocation9 + $0x40] sm:$0xff] }
  0x22   :  { %221 = vmatpush.msra.mxu2 %v198_v24  ;;  %244 = vmatpush.msra.mxu3 %v214_v25  ;;  %v210_v41 = vld [vmem:[#allocation9 + $0xc0] sm:$0xff]  ;;  %v193_v44 = vld [vmem:[#allocation9 + $0x38] sm:$0xff]  ;;  %v98_v46 = vld [vmem:[#allocation6 + $0x10] sm:$0xff] }
  0x23   :  { %141 = vmatpush.msra.mxu0 %v112_v14  ;;  %164 = vmatpush.msra.mxu1 %v113_v17  ;;  %v100_v42 = vld [vmem:[#allocation6 + $0x20] sm:$0xff]  ;;  %v101_v43 = vld [vmem:[#allocation6 + $0x28] sm:$0xff]  ;;  %v99_v47 = vld [vmem:[#allocation6 + $0x18] sm:$0xff] }
  0x24   :  { %222 = vmatpush.msra.mxu2 %v197_v28  ;;  %245 = vmatpush.msra.mxu3 %v213_v29  ;;  %v209_v45 = vld [vmem:[#allocation9 + $0xb8] sm:$0xff]  ;;  %v192_v48 = vld [vmem:[#allocation9 + $0x30] sm:$0xff]  ;;  %v97_v51 = vld [vmem:[#allocation6 + $0x8] sm:$0xff] }
  0x25   :  { %142 = vmatpush.msra.mxu0 %v110_v22  ;;  %165 = vmatpush.msra.mxu1 %v111_v23  ;;  %v208_v49 = vld [vmem:[#allocation9 + $0xb0] sm:$0xff]  ;;  %v96_v50 = vld [vmem:[#allocation6] sm:$0xff]  ;;  %v191_v53 = vld [vmem:[#allocation9 + $0x28] sm:$0xff] }
  0x26   :  { %223 = vmatpush.msra.mxu2 %v196_v33  ;;  %246 = vmatpush.msra.mxu3 %v212_v34  ;;  %v94_v52 = vld [vmem:[#allocation3] sm:$0xff]  ;;  %v190_v55 = vld [vmem:[#allocation9 + $0x20] sm:$0xff]  ;;  %v189_v57 = vld [vmem:[#allocation9 + $0x18] sm:$0xff] }
  0x27   :  { %143 = vmatpush.msra.mxu0 %v108_v26  ;;  %166 = vmatpush.msra.mxu1 %v109_v27  ;;  %v207_v54 = vld [vmem:[#allocation9 + $0xa8] sm:$0xff]  ;;  %v206_v56 = vld [vmem:[#allocation9 + $0xa0] sm:$0xff]  ;;  %v205_v58 = vld [vmem:[#allocation9 + $0x98] sm:$0xff] }
  0x28   :  { %224 = vmatpush.msra.mxu2 %v195_v36  ;;  %247 = vmatpush.msra.mxu3 %v211_v37  ;;  %v95_v59 = vld [vmem:[#allocation3 + $0x8] sm:$0xff]  ;;  %v187_v62 = vld [vmem:[#allocation9 + $0x8] sm:$0xff]  ;;  %v186_v0 = vld [vmem:[#allocation9] sm:$0xff] }
  0x29   :  { %144 = vmatpush.msra.mxu0 %v106_v30  ;;  %167 = vmatpush.msra.mxu1 %v107_v31  ;;  %v188_v60 = vld [vmem:[#allocation9 + $0x10] sm:$0xff]  ;;  %v203_v63 = vld [vmem:[#allocation9 + $0x88] sm:$0xff]  ;;  %v202_v1 = vld [vmem:[#allocation9 + $0x80] sm:$0xff] }
  0x2a   :  { %225 = vmatpush.msra.mxu2 %v194_v40  ;;  %248 = vmatpush.msra.mxu3 %v210_v41  ;;  %v204_v61 = vld [vmem:[#allocation9 + $0x90] sm:$0xff]  ;;  %v128_v2 = vld [vmem:[#allocation8] sm:$0x3]  ;;  %v373_v17 = vld [vmem:[%s594_s4] ss:$0 sm:$0xff] }
  0x2b   :  { %145 = vmatpush.msra.mxu0 %v104_v32  ;;  %168 = vmatpush.msra.mxu1 %v105_v35  ;;  %v130_v3 = vperm.slane %v128_v2, 0  ;;  %v131_v4 = vperm.slane %v128_v2, 1 }
  0x2c   :  { %226 = vmatpush.msra.mxu2 %v193_v44  ;;  %249 = vmatpush.msra.mxu3 %v209_v45 }
  0x2d   :  { %146 = vmatpush.msra.mxu0 %v102_v38  ;;  %169 = vmatpush.msra.mxu1 %v103_v39 }
  0x2e   :  { %227 = vmatpush.msra.mxu2 %v192_v48  ;;  %250 = vmatpush.msra.mxu3 %v208_v49 }
  0x2f   :  { %147 = vmatpush.msra.mxu0 %v100_v42  ;;  %170 = vmatpush.msra.mxu1 %v101_v43 }
  0x30   :  { %228 = vmatpush.msra.mxu2 %v191_v53  ;;  %251 = vmatpush.msra.mxu3 %v207_v54 }
  0x31   :  { %148 = vmatpush.msra.mxu0 %v98_v46  ;;  %171 = vmatpush.msra.mxu1 %v99_v47 }
  0x32   :  { %229 = vmatpush.msra.mxu2 %v190_v55  ;;  %252 = vmatpush.msra.mxu3 %v206_v56  ;;  %v374_v55 = vld [vmem:[%s595_s5] ss:$0 sm:$0xff]  ;;  %s516_s5 = smov [#allocation11]  }
  0x33   :  { %149 = vmatpush.msra.mxu0 %v96_v50  ;;  %172 = vmatpush.msra.mxu1 %v97_v51  ;;  %s347_s26 = sshll.u32 %s516_s5, 4  ;;  %s348_s26 = int_to_ptr.vmem [resolvable:$true] %s347_s26 }
  0x34   :  { %150 = vmatmul.f32.vlgmr.msra.gmra.mxu0 %v94_v52  ;;  %173 = vmatmul.f32.vlgmr.msra.gmra.mxu1 %v94_v52 }
  0x35   :  { %230 = vmatpush.msra.mxu2 %v189_v57  ;;  %253 = vmatpush.msra.mxu3 %v205_v58 }
  0x37   :  { %231 = vmatpush.msra.mxu2 %v188_v60  ;;  %254 = vmatpush.msra.mxu3 %v204_v61 }
  0x39   :  { %232 = vmatpush.msra.mxu2 %v187_v62  ;;  %255 = vmatpush.msra.mxu3 %v203_v63 }
  0x3b   :  { %233 = vmatpush.msra.mxu2 %v186_v0  ;;  %256 = vmatpush.msra.mxu3 %v202_v1 }
  0x3c   :  { %153 = vmatmul.f32.gmra.mxu0 %v95_v59  ;;  %176 = vmatmul.f32.gmra.mxu1 %v95_v59 }
  0xb1   :  { %v151_v5 = vpop.f32.mrf.mxu0  ;;  %v174_v6 = vpop.f32.mrf.mxu1 }
  0xb2   :  { %v152_v7 = vadd.f32 %v151_v5, %v130_v3  ;;  %v175_v8 = vadd.f32 %v174_v6, %v131_v4 }
  0xb4   :  { %v180_v9 = vmax.f32 %v152_v7, 0.0  ;;  %v181_v10 = vmax.f32 %v175_v8, 0.0 }
  0xb6   :  { %234 = vmatmul.f32.vlgmr.msra.gmra.mxu2 %v180_v9  ;;  %257 = vmatmul.f32.vlgmr.msra.gmra.mxu3 %v181_v10 }
  0xb9   :  { %v154_v11 = vpop.f32.mrf.mxu0  ;;  %v177_v12 = vpop.f32.mrf.mxu1 }
  0xba   :  { %v155_v13 = vadd.f32 %v154_v11, %v130_v3  ;;  %v178_v14 = vadd.f32 %v177_v12, %v131_v4 }
  0xbc   :  { %v182_v15 = vmax.f32 %v155_v13, 0.0  ;;  %v183_v16 = vmax.f32 %v178_v14, 0.0 }
  0xbe   :  { %237 = vmatmul.f32.gmra.mxu2 %v182_v15  ;;  %260 = vmatmul.f32.gmra.mxu3 %v183_v16 }
 0x139   :  { %v235_v18 = vpop.f32.mrf.mxu2  ;;  %v258_v19 = vpop.f32.mrf.mxu3 }
 0x13a   :  { %v259_v20 = vadd.f32 %v258_v19, %v235_v18 }
 0x13c   :  { %v279_v21 = vadd.f32 %v373_v17, %v259_v20 }
 0x13e   :  { %v281_v22 = vadd.f32 %v279_v21, %v94_v52 }
 0x140   :  { %283 = vadd.xlane.f32.xlu0 %v281_v22  ;;  %v287_v23 = vmul.f32 %v281_v22, %v281_v22 }
 0x141   :  { %v238_v24 = vpop.f32.mrf.mxu2  ;;  %v261_v25 = vpop.f32.mrf.mxu3 }
 0x142   :  { %v262_v26 = vadd.f32 %v261_v25, %v238_v24  ;;  %289 = vadd.xlane.f32.xlu1 %v287_v23 }
 0x144   :  { %v280_v27 = vadd.f32 %v373_v17, %v262_v26 }
 0x146   :  { %v282_v28 = vadd.f32 %v280_v27, %v95_v59  ;;  %v375_v59 = vld [vmem:[%s596_s6] ss:$0 sm:$0xff] }
 0x148   :  { %285 = vadd.xlane.f32.xlu0 %v282_v28  ;;  %v288_v29 = vmul.f32 %v282_v28, %v282_v28 }
 0x14a   :  { %291 = vadd.xlane.f32.xlu1 %v288_v29 }
 0x1b3   :  { %v284_v30 = vpop.xlane.xlu0 %283 }
 0x1b4   :  { %v293_v31 = vmul.f32 0.03125, %v284_v30 }
 0x1b5   :  { %v290_v32 = vpop.xlane.xlu1 %289 }
 0x1b6   :  { %v297_v33 = vmul.f32 %v293_v31, %v293_v31  ;;  %v295_v34 = vmul.f32 0.03125, %v290_v32  ;;  %v303_v53 = vsub.f32 %v281_v22, %v293_v31 }
 0x1b8   :  { %v299_v35 = vsub.f32 %v295_v34, %v297_v33 }
 0x1ba   :  { %v301_v36 = vmax.f32 %v299_v35, 0.0 }
 0x1bb   :  { %v286_v37 = vpop.xlane.xlu0 %285 }
 0x1bc   :  { %v305_v38 = vadd.f32 1e-05, %v301_v36  ;;  %v294_v39 = vmul.f32 0.03125, %v286_v37 }
 0x1bd   :  { %v292_v40 = vpop.xlane.xlu1 %291 }
 0x1be   :  { %376 = vrsqrt.f32 %v305_v38  ;;  %v298_v41 = vmul.f32 %v294_v39, %v294_v39  ;;  %v296_v42 = vmul.f32 0.03125, %v292_v40  ;;  %vm313_vm1 = vweird.f32 %v305_v38 }
 0x1bf   :  { %v304_v1 = vsub.f32 %v282_v28, %v294_v39 }
 0x1c0   :  { %v300_v43 = vsub.f32 %v296_v42, %v298_v41 }
 0x1c2   :  { %v302_v44 = vmax.f32 %v300_v43, 0.0 }
 0x1c4   :  { %v377_v45 = vpop.eup %376  ;;  %v306_v47 = vadd.f32 1e-05, %v302_v44 }
 0x1c5   :  { %v308_v46 = vmul.f32 %v377_v45, %v305_v38  ;;  %vm314_vm0 = vweird.f32 %v377_v45 }
 0x1c6   :  { %378 = vrsqrt.f32 %v306_v47  ;;  %vm315_vm2 = vmor %vm313_vm1, %vm314_vm0  ;;  %vm323_vm4 = vweird.f32 %v306_v47 }
 0x1c7   :  { %v309_v48 = vmul.f32 %v377_v45, %v308_v46 }
 0x1c9   :  { %v310_v49 = vmul.f32 0.5, %v309_v48 }
 0x1cb   :  { %v311_v50 = vsub.f32 1.5, %v310_v49 }
 0x1cc   :  { %v379_v51 = vpop.eup %378 }
 0x1cd   :  { %v312_v52 = vmul.f32 %v377_v45, %v311_v50  ;;  %v318_v54 = vmul.f32 %v379_v51, %v306_v47  ;;  %vm324_vm3 = vweird.f32 %v379_v51 }
 0x1ce   :  { %vm325_vm5 = vmor %vm323_vm4, %vm324_vm3 }
 0x1cf   :  { %v316_v56 = vsel %vm315_vm2, %v377_v45, %v312_v52  ;;  %v319_v57 = vmul.f32 %v379_v51, %v318_v54 }
 0x1d0   :  { %v327_v58 = vmul.f32 %v316_v56, %v303_v53 }
 0x1d1   :  { %v320_v60 = vmul.f32 0.5, %v319_v57 }
 0x1d2   :  { %v333_v61 = vmul.f32 %v374_v55, %v327_v58 }
 0x1d3   :  { %v321_v62 = vsub.f32 1.5, %v320_v60 }
 0x1d4   :  { %v339_v63 = vadd.f32 %v375_v59, %v333_v61 }
 0x1d5   :  { %v322_v0 = vmul.f32 %v379_v51, %v321_v62 }
 0x1d6   :  { %341 = vst [vmem:[#allocation11] sm:$0xff] %v339_v63 }
 0x1d7   :  { %v326_v2 = vsel %vm325_vm5, %v379_v51, %v322_v0 }
 0x1d8   :  { %v328_v3 = vmul.f32 %v326_v2, %v304_v1 }
 0x1da   :  { %v334_v4 = vmul.f32 %v374_v55, %v328_v3 }
 0x1dc   :  { %v340_v5 = vadd.f32 %v375_v59, %v334_v4 }
 0x1de   :  { %342 = vst [vmem:[#allocation11 + $0x8] sm:$0xff] %v340_v5 }
 0x1df   :  { %355 = dma.vmem_to_hbm [thread:$0]  %s348_s26, 256, %s350_s29, [#allocation5], %s512_s13, %s512_s13, %s513_s14  }
 0x1e0   :  { %506 = dma.done.wait [#allocation5], 256  }
 0x1e1   :  { %507 = vsyncadd [#allocation5], 4294967040 }
 0x1e2   :  { %360 = vsyncpa [#allocation4], 1 }
 0x1e3   :  { %361 = vsyncpa [#allocation7], 1 }
 0x1e4   :  { %362 = vsyncpa [#allocation10], 1 }
 0x1e5   :  { %363 = vsyncpa [#allocation5], 1 }

</bundles_post_ra>
